<compile_context>
chip_gen: v6e
topology: v6e:2x2x1
jax: 0.10.0
libtpu: 0.0.40
codegen_flags: <defaults>
</compile_context>

<pallas_src>
import functools
import math

import jax
import jax.numpy as jnp
from jax import lax
from jax.experimental import pallas as pl
from jax.experimental.pallas import tpu as pltpu


def _round_up(x, m):
    return ((x + m - 1) // m) * m


def _choose_row_tile(n):
    # Row tile for the (N, N) similarity outputs.  Small problems: one tile;
    # large problems: 256 rows (full MXU M on v6e/v7x, (8,128)-legal).
    if n <= 256:
        return _round_up(max(n, 8), 8)
    return 256


# ----------------------------------------------------------------------------
# Fused Pallas kernel: MLP (all views) + feature_dis + fusion, row-tiled grid.
# ----------------------------------------------------------------------------
def _fused_forward_kernel(*refs, view_num, n_layers, d_out, tile_m, eps):
    # refs: [x, (W_0,b_0)...(W_{L-1},b_{L-1}),
    #        packed_out, sim_0..sim_{V-1}, en_scratch]
    x_ref = refs[0]
    wb = refs[1:1 + 2 * n_layers]
    o = 1 + 2 * n_layers
    packed_ref = refs[o]                       # (Np, (V+1)*d_out) f32, resident
    sim_refs = refs[o + 1:o + 1 + view_num]    # each (tile_m, Np) per step
    en_ref = refs[o + 1 + view_num]            # VMEM scratch (Np, V*d_out) bf16

    i = pl.program_id(0)
    n_pad = en_ref.shape[0]

    # --- Prologue (grid step 0 only): view-batched MLP + normalization -------
    @pl.when(i == 0)
    def _():
        h = x_ref[...]
        for li in range(n_layers):
            w = wb[2 * li][...]                       # bf16 (pre-cast)
            b = wb[2 * li + 1][...]                   # f32
            h = jnp.dot(h.astype(jnp.bfloat16), w,
                        preferred_element_type=jnp.float32) + b
            if li != n_layers - 1:
                h = jnp.maximum(h, 0.0)
        # h: (Np, V*d_out) f32, resident in VMEM/vregs.
        fusion = jnp.zeros((n_pad, d_out), jnp.float32)
        en_cols = []
        for v in range(view_num):
            e = h[:, v * d_out:(v + 1) * d_out]
            fusion = fusion + e
            inv = lax.rsqrt(jnp.sum(e * e, axis=1, keepdims=True) + eps)
            en_cols.append((e * inv).astype(jnp.bfloat16))
        en_ref[...] = jnp.concatenate(en_cols, axis=1)
        # Single lane-dense packed output: [embed_0 | ... | embed_{V-1} | fusion].
        packed_ref[...] = jnp.concatenate([h, fusion * (1.0 / view_num)], axis=1)

    # --- Per-step: one row tile of every view's cosine-similarity matrix -----
    row_start = pl.multiple_of(i * tile_m, tile_m)
    en_rows = en_ref[pl.ds(row_start, tile_m), :]     # (tile_m, V*d_out) bf16
    en_all = en_ref[...]                              # (Np, V*d_out) bf16

    r_idx = row_start + lax.broadcasted_iota(jnp.int32, (tile_m, n_pad), 0)
    c_idx = lax.broadcasted_iota(jnp.int32, (tile_m, n_pad), 1)
    off_diag = r_idx != c_idx

    dn = (((1,), (1,)), ((), ()))                     # contract last dim of both
    for v in range(view_num):
        rv = en_rows[:, v * d_out:(v + 1) * d_out]
        cv = en_all[:, v * d_out:(v + 1) * d_out]
        sim = lax.dot_general(rv, cv, dimension_numbers=dn,
                              preferred_element_type=jnp.float32)
        sim_refs[v][...] = jnp.where(off_diag, sim, 0.0)


def _full_spec(shape):
    nd = len(shape)
    return pl.BlockSpec(shape, lambda i, _nd=nd: (0,) * _nd)


def fused_forward(x, fused_layers, view_num, d_out):
    n, n_in = x.shape
    n_layers = len(fused_layers)

    tile_m = _choose_row_tile(n)
    n_pad = _round_up(n, tile_m)
    steps = n_pad // tile_m

    if n_pad != n:
        x_p = jnp.zeros((n_pad, n_in), x.dtype).at[:n, :].set(x)
    else:
        x_p = x

    flat_inputs = [x_p]
    for (w, b) in fused_layers:
        flat_inputs += [w, b]

    packed_cols = (view_num + 1) * d_out
    out_shape = tuple(
        [jax.ShapeDtypeStruct((n_pad, packed_cols), jnp.float32)]
        + [jax.ShapeDtypeStruct((n_pad, n_pad), jnp.float32)
           for _ in range(view_num)]
    )
    out_specs = tuple(
        [pl.BlockSpec((n_pad, packed_cols), lambda i: (0, 0))]
        + [pl.BlockSpec((tile_m, n_pad), lambda i: (i, 0))
           for _ in range(view_num)]
    )
    in_specs = [_full_spec(a.shape) for a in flat_inputs]

    kernel = functools.partial(
        _fused_forward_kernel,
        view_num=view_num, n_layers=n_layers, d_out=d_out,
        tile_m=tile_m, eps=1e-12,
    )
    outs = pl.pallas_call(
        kernel,
        out_shape=out_shape,
        grid_spec=pltpu.PrefetchScalarGridSpec(
            num_scalar_prefetch=0,
            grid=(steps,),
            in_specs=in_specs,
            out_specs=out_specs,
            scratch_shapes=[
                pltpu.VMEM((n_pad, view_num * d_out), jnp.bfloat16),
            ],
        ),
        compiler_params=pltpu.CompilerParams(
            dimension_semantics=("arbitrary",),
        ),
    )(*flat_inputs)

    packed = outs[0]
    embed_list = [packed[:n, v * d_out:(v + 1) * d_out] for v in range(view_num)]
    embed_fusion = packed[:n, view_num * d_out:]
    s_list = [outs[1 + v][:n, :n] for v in range(view_num)]
    return embed_list, s_list, embed_fusion


# ----------------------------------------------------------------------------
# Parameter setup (plain JAX) + view-batched weight packing (bf16 for MXU)
# ----------------------------------------------------------------------------
def xavier_uniform(key, fan_in, fan_out):
    a = math.sqrt(6.0 / (fan_in + fan_out))
    return jax.random.uniform(key, (fan_in, fan_out), jnp.float32, -a, a)


def _block_diag(ws):
    rows = sum(w.shape[0] for w in ws)
    cols = sum(w.shape[1] for w in ws)
    bd = jnp.zeros((rows, cols), jnp.float32)
    r = c = 0
    for w in ws:
        bd = bd.at[r:r + w.shape[0], c:c + w.shape[1]].set(w)
        r += w.shape[0]
        c += w.shape[1]
    return bd


def init_params(key, n_in, view_num, cfg, num_community):
    params = {"encoders": [], "init": []}
    dims = [n_in] + list(cfg)
    for _ in range(view_num):
        layers = []
        for li in range(len(cfg)):
            key, kw = jax.random.split(key)
            w = xavier_uniform(kw, dims[li], dims[li + 1])
            b = jnp.zeros((1, dims[li + 1]), jnp.float32)   # bias filled with 0.0
            layers.append((w, b))
        params["encoders"].append(layers)
        key, ki = jax.random.split(key)
        # nn.Parameter(torch.rand(...)), requires_grad=False -- unused in forward
        params["init"].append(
            jax.random.uniform(ki, (num_community, cfg[-1]), jnp.float32))

    # Pre-pack view-batched weights for the fused kernel (done once).
    # Weights cast to bf16 (MXU-native on v6e/v7x); biases stay f32.
    fused = []
    for li in range(len(cfg)):
        ws = [params["encoders"][v][li][0] for v in range(view_num)]
        bs = [params["encoders"][v][li][1] for v in range(view_num)]
        b_cat = jnp.concatenate(bs, axis=1)
        if li == 0:
            w_cat = jnp.concatenate(ws, axis=1)   # shared input x -> concat outputs
        else:
            w_cat = _block_diag(ws)               # per-view inputs -> block diagonal
        fused.append((w_cat.astype(jnp.bfloat16), b_cat))
    params["fused_layers"] = fused
    return params


def model_forward(params, x, adjs, view_num):
    # eval mode: dropout over x is identity for every view, so a single x feeds
    # the fused kernel; adjs is only used by the reference code for replication.
    del adjs
    d_out = params["fused_layers"][-1][0].shape[1] // view_num
    return fused_forward(x, params["fused_layers"], view_num, d_out)


# ----------------------------------------------------------------------------
# Pure-JAX reference (f32, HIGHEST precision) for a numerical sanity check
# ----------------------------------------------------------------------------
def reference_forward(params, x, view_num):
    hp = jax.lax.Precision.HIGHEST
    embeds, sims = [], []
    for v in range(view_num):
        h = x
        layers = params["encoders"][v]
        for i, (w, b) in enumerate(layers):
            h = jnp.dot(h, w, precision=hp) + b
            if i != len(layers) - 1:
                h = jnp.maximum(h, 0.0)
        embeds.append(h)
        norm = jnp.sqrt(jnp.sum(h * h, axis=1, keepdims=True))
        sim = jnp.dot(h, h.T, precision=hp) / jnp.dot(norm, norm.T, precision=hp)
        sim = sim * (1.0 - jnp.eye(h.shape[0], dtype=jnp.float32))
        sims.append(sim)
    fusion = sum(embeds) / view_num
    return embeds, sims, fusion


# ----------------------------------------------------------------------------
if __name__ == "__main__":
    key = jax.random.PRNGKey(0)

    N = 8            # number of nodes
    n_in = 32        # input feature dim
    cfg = [64, 16]   # MLP hidden sizes; final embedding dim = 16
    view_num = 2
    num_community = 10

    key, kp, kx = jax.random.split(key, 3)
    params = init_params(kp, n_in, view_num, cfg, num_community)
    x = jax.random.normal(kx, (N, n_in), jnp.float32)
    adjs = [jnp.eye(N, dtype=jnp.float32) for _ in range(view_num)]  # only len(adjs) matters

    fwd = jax.jit(functools.partial(model_forward, view_num=view_num))
    embed_list, s_list, embed_fusion = fwd(params, x, adjs)
    jax.block_until_ready((embed_list, s_list, embed_fusion))

    # Shape checks
    assert embed_fusion.shape == (N, cfg[-1])
    assert all(e.shape == (N, cfg[-1]) for e in embed_list)
    assert all(s.shape == (N, N) for s in s_list)

    # Numerical check vs. f32 HIGHEST-precision reference.
    # Kernel uses bf16 MXU inputs with f32 accumulation -> loose tolerance.
    ref_embeds, ref_sims, ref_fusion = reference_forward(params, x, view_num)
    for v in range(view_num):
        assert jnp.allclose(embed_list[v], ref_embeds[v], rtol=3e-2, atol=3e-2)
        assert jnp.allclose(s_list[v], ref_sims[v], rtol=3e-2, atol=3e-2)
    assert jnp.allclose(embed_fusion, ref_fusion, rtol=3e-2, atol=3e-2)

    print("KERNEL_OK")
</pallas_src>

<mosaic_0001>
module attributes {stable_mosaic.version = 11 : i64} {
  func.func @_fused_forward_kernel(%arg0: i32, %arg1: memref<8x32xf32, #tpu.memory_space<vmem>>, %arg2: memref<32x128xbf16, #tpu.memory_space<vmem>>, %arg3: memref<1x128xf32, #tpu.memory_space<vmem>>, %arg4: memref<128x32xbf16, #tpu.memory_space<vmem>>, %arg5: memref<1x32xf32, #tpu.memory_space<vmem>>, %arg6: memref<8x48xf32, #tpu.memory_space<vmem>>, %arg7: memref<8x8xf32, #tpu.memory_space<vmem>>, %arg8: memref<8x8xf32, #tpu.memory_space<vmem>>, %arg9: memref<8x32xbf16, #tpu.memory_space<vmem>>) attributes {dimension_semantics = [#tpu.dimension_semantics<arbitrary>], iteration_bounds = array<i64: 1>, scalar_prefetch = 0 : i64, scratch_operands = 1 : i64, tpu.core_type = #tpu.core_type<tc>, window_params = [{pipeline_mode = #tpu.pipeline_mode<synchronous>, transform_indices = @transform_0, window_bounds = array<i64: 8, 32>}, {pipeline_mode = #tpu.pipeline_mode<synchronous>, transform_indices = @transform_1, window_bounds = array<i64: 32, 128>}, {pipeline_mode = #tpu.pipeline_mode<synchronous>, transform_indices = @transform_2, window_bounds = array<i64: 1, 128>}, {pipeline_mode = #tpu.pipeline_mode<synchronous>, transform_indices = @transform_3, window_bounds = array<i64: 128, 32>}, {pipeline_mode = #tpu.pipeline_mode<synchronous>, transform_indices = @transform_4, window_bounds = array<i64: 1, 32>}, {pipeline_mode = #tpu.pipeline_mode<synchronous>, transform_indices = @transform_5, window_bounds = array<i64: 8, 48>}, {transform_indices = @transform_6, window_bounds = array<i64: 8, 8>}, {transform_indices = @transform_7, window_bounds = array<i64: 8, 8>}]} {
    %c0_i32 = arith.constant 0 : i32
    %0 = arith.cmpi eq, %arg0, %c0_i32 : i32
    %1 = arith.extui %0 : i1 to i32
    %c0_i32_0 = arith.constant 0 : i32
    %2 = arith.cmpi ne, %1, %c0_i32_0 : i32
    scf.if %2 {
      %c0_10 = arith.constant 0 : index
      %c0_11 = arith.constant 0 : index
      %25 = vector.load %arg1[%c0_10, %c0_11] : memref<8x32xf32, #tpu.memory_space<vmem>>, vector<8x32xf32>
      %c0_12 = arith.constant 0 : index
      %c0_13 = arith.constant 0 : index
      %26 = vector.load %arg2[%c0_12, %c0_13] : memref<32x128xbf16, #tpu.memory_space<vmem>>, vector<32x128xbf16>
      %c0_14 = arith.constant 0 : index
      %c0_15 = arith.constant 0 : index
      %27 = vector.load %arg3[%c0_14, %c0_15] : memref<1x128xf32, #tpu.memory_space<vmem>>, vector<1x128xf32>
      %28 = arith.truncf %25 : vector<8x32xf32> to vector<8x32xbf16>
      %cst_16 = arith.constant dense<0.000000e+00> : vector<8x128xf32>
      %29 = tpu.matmul %28, %26, %cst_16 {dimension_numbers = #tpu.dot_dimension_numbers<[1], [0], [0], [1], [0, 0, 1, 1], [], []>} : vector<8x32xbf16>, vector<32x128xbf16>, vector<8x128xf32> -> vector<8x128xf32>
      %30 = vector.broadcast %27 : vector<1x128xf32> to vector<8x128xf32>
      %31 = arith.addf %29, %30 : vector<8x128xf32>
      %cst_17 = arith.constant 0.000000e+00 : f32
      %32 = vector.broadcast %cst_17 : f32 to vector<8x128xf32>
      %33 = arith.maximumf %31, %32 : vector<8x128xf32>
      %c0_18 = arith.constant 0 : index
      %c0_19 = arith.constant 0 : index
      %34 = vector.load %arg4[%c0_18, %c0_19] : memref<128x32xbf16, #tpu.memory_space<vmem>>, vector<128x32xbf16>
      %c0_20 = arith.constant 0 : index
      %c0_21 = arith.constant 0 : index
      %35 = vector.load %arg5[%c0_20, %c0_21] : memref<1x32xf32, #tpu.memory_space<vmem>>, vector<1x32xf32>
      %36 = arith.truncf %33 : vector<8x128xf32> to vector<8x128xbf16>
      %cst_22 = arith.constant dense<0.000000e+00> : vector<8x32xf32>
      %37 = tpu.matmul %36, %34, %cst_22 {dimension_numbers = #tpu.dot_dimension_numbers<[1], [0], [0], [1], [0, 0, 1, 1], [], []>} : vector<8x128xbf16>, vector<128x32xbf16>, vector<8x32xf32> -> vector<8x32xf32>
      %38 = vector.broadcast %35 : vector<1x32xf32> to vector<8x32xf32>
      %39 = arith.addf %37, %38 : vector<8x32xf32>
      %cst_23 = arith.constant 0.000000e+00 : f32
      %40 = vector.broadcast %cst_23 : f32 to vector<8x16xf32>
      %41 = vector.extract_strided_slice %39 {offsets = [0, 0], sizes = [8, 16], strides = [1, 1]} : vector<8x32xf32> to vector<8x16xf32>
      %42 = arith.addf %40, %41 : vector<8x16xf32>
      %43 = arith.mulf %41, %41 : vector<8x16xf32>
      %cst_24 = arith.constant dense<0.000000e+00> : vector<8xf32>
      %44 = vector.multi_reduction <add>, %43, %cst_24 [1] : vector<8x16xf32> to vector<8xf32>
      %45 = vector.shape_cast %44 : vector<8xf32> to vector<8x1xf32>
      %cst_25 = arith.constant 9.99999996E-13 : f32
      %46 = vector.broadcast %cst_25 : f32 to vector<8x1xf32>
      %47 = arith.addf %45, %46 : vector<8x1xf32>
      %48 = math.rsqrt %47 : vector<8x1xf32>
      %49 = vector.broadcast %48 : vector<8x1xf32> to vector<8x16xf32>
      %50 = arith.mulf %41, %49 : vector<8x16xf32>
      %51 = arith.truncf %50 : vector<8x16xf32> to vector<8x16xbf16>
      %52 = vector.extract_strided_slice %39 {offsets = [0, 16], sizes = [8, 16], strides = [1, 1]} : vector<8x32xf32> to vector<8x16xf32>
      %53 = arith.addf %42, %52 : vector<8x16xf32>
      %54 = arith.mulf %52, %52 : vector<8x16xf32>
      %cst_26 = arith.constant dense<0.000000e+00> : vector<8xf32>
      %55 = vector.multi_reduction <add>, %54, %cst_26 [1] : vector<8x16xf32> to vector<8xf32>
      %56 = vector.shape_cast %55 : vector<8xf32> to vector<8x1xf32>
      %cst_27 = arith.constant 9.99999996E-13 : f32
      %57 = vector.broadcast %cst_27 : f32 to vector<8x1xf32>
      %58 = arith.addf %56, %57 : vector<8x1xf32>
      %59 = math.rsqrt %58 : vector<8x1xf32>
      %60 = vector.broadcast %59 : vector<8x1xf32> to vector<8x16xf32>
      %61 = arith.mulf %52, %60 : vector<8x16xf32>
      %62 = arith.truncf %61 : vector<8x16xf32> to vector<8x16xbf16>
      %63 = tpu.concatenate %51, %62 in 1 : vector<8x16xbf16>, vector<8x16xbf16> -> vector<8x32xbf16>
      %c0_28 = arith.constant 0 : index
      %c0_29 = arith.constant 0 : index
      %64 = vector.load %arg9[%c0_28, %c0_29] : memref<8x32xbf16, #tpu.memory_space<vmem>>, vector<8x32xbf16>
      tpu.vector_store %arg9[%c0_28, %c0_29], %63 {strides = array<i32>} : memref<8x32xbf16, #tpu.memory_space<vmem>>, vector<8x32xbf16>,
      %cst_30 = arith.constant 5.000000e-01 : f32
      %65 = vector.broadcast %cst_30 : f32 to vector<8x16xf32>
      %66 = arith.mulf %53, %65 : vector<8x16xf32>
      %67 = tpu.concatenate %39, %66 in 1 : vector<8x32xf32>, vector<8x16xf32> -> vector<8x48xf32>
      %c0_31 = arith.constant 0 : index
      %c0_32 = arith.constant 0 : index
      %68 = vector.load %arg6[%c0_31, %c0_32] : memref<8x48xf32, #tpu.memory_space<vmem>>, vector<8x48xf32>
      tpu.vector_store %arg6[%c0_31, %c0_32], %67 {strides = array<i32>} : memref<8x48xf32, #tpu.memory_space<vmem>>, vector<8x48xf32>,
    } else {
    }
    %c8_i32 = arith.constant 8 : i32
    %3 = arith.muli %arg0, %c8_i32 : i32
    %4 = tpu.assume_multiple %3, 8 : i32
    %5 = arith.index_cast %4 : i32 to index
    %c0 = arith.constant 0 : index
    %6 = vector.load %arg9[%5, %c0] : memref<8x32xbf16, #tpu.memory_space<vmem>>, vector<8x32xbf16>
    %c0_1 = arith.constant 0 : index
    %c0_2 = arith.constant 0 : index
    %7 = vector.load %arg9[%c0_1, %c0_2] : memref<8x32xbf16, #tpu.memory_space<vmem>>, vector<8x32xbf16>
    %8 = tpu.iota {dimensions = array<i32: 0>} : vector<8x8xi32>
    %9 = vector.broadcast %4 : i32 to vector<8x8xi32>
    %10 = arith.addi %9, %8 : vector<8x8xi32>
    %11 = tpu.iota {dimensions = array<i32: 1>} : vector<8x8xi32>
    %12 = arith.cmpi ne, %10, %11 : vector<8x8xi32>
    %13 = vector.extract_strided_slice %6 {offsets = [0, 0], sizes = [8, 16], strides = [1, 1]} : vector<8x32xbf16> to vector<8x16xbf16>
    %14 = vector.extract_strided_slice %7 {offsets = [0, 0], sizes = [8, 16], strides = [1, 1]} : vector<8x32xbf16> to vector<8x16xbf16>
    %cst = arith.constant dense<0.000000e+00> : vector<8x8xf32>
    %15 = tpu.matmul %13, %14, %cst {dimension_numbers = #tpu.dot_dimension_numbers<[1], [1], [0], [0], [0, 0, 1, 0], [], []>} : vector<8x16xbf16>, vector<8x16xbf16>, vector<8x8xf32> -> vector<8x8xf32>
    %cst_3 = arith.constant 0.000000e+00 : f32
    %16 = vector.broadcast %cst_3 : f32 to vector<8x8xf32>
    %17 = arith.select %12, %15, %16 : vector<8x8xi1>, vector<8x8xf32>
    %c0_4 = arith.constant 0 : index
    %c0_5 = arith.constant 0 : index
    %18 = vector.load %arg7[%c0_4, %c0_5] : memref<8x8xf32, #tpu.memory_space<vmem>>, vector<8x8xf32>
    tpu.vector_store %arg7[%c0_4, %c0_5], %17 {strides = array<i32>} : memref<8x8xf32, #tpu.memory_space<vmem>>, vector<8x8xf32>,
    %19 = vector.extract_strided_slice %6 {offsets = [0, 16], sizes = [8, 16], strides = [1, 1]} : vector<8x32xbf16> to vector<8x16xbf16>
    %20 = vector.extract_strided_slice %7 {offsets = [0, 16], sizes = [8, 16], strides = [1, 1]} : vector<8x32xbf16> to vector<8x16xbf16>
    %cst_6 = arith.constant dense<0.000000e+00> : vector<8x8xf32>
    %21 = tpu.matmul %19, %20, %cst_6 {dimension_numbers = #tpu.dot_dimension_numbers<[1], [1], [0], [0], [0, 0, 1, 0], [], []>} : vector<8x16xbf16>, vector<8x16xbf16>, vector<8x8xf32> -> vector<8x8xf32>
    %cst_7 = arith.constant 0.000000e+00 : f32
    %22 = vector.broadcast %cst_7 : f32 to vector<8x8xf32>
    %23 = arith.select %12, %21, %22 : vector<8x8xi1>, vector<8x8xf32>
    %c0_8 = arith.constant 0 : index
    %c0_9 = arith.constant 0 : index
    %24 = vector.load %arg8[%c0_8, %c0_9] : memref<8x8xf32, #tpu.memory_space<vmem>>, vector<8x8xf32>
    tpu.vector_store %arg8[%c0_8, %c0_9], %23 {strides = array<i32>} : memref<8x8xf32, #tpu.memory_space<vmem>>, vector<8x8xf32>,
    return
  }
  func.func @transform_0(%arg0: i32) -> (i32, i32) {
    %c0_i32 = arith.constant 0 : i32
    %c0_i32_0 = arith.constant 0 : i32
    %c0_i32_1 = arith.constant 0 : i32
    return %c0_i32, %c0_i32_0 : i32, i32
  }
  func.func @transform_1(%arg0: i32) -> (i32, i32) {
    %c0_i32 = arith.constant 0 : i32
    %c0_i32_0 = arith.constant 0 : i32
    %c0_i32_1 = arith.constant 0 : i32
    return %c0_i32, %c0_i32_0 : i32, i32
  }
  func.func @transform_2(%arg0: i32) -> (i32, i32) {
    %c0_i32 = arith.constant 0 : i32
    %c0_i32_0 = arith.constant 0 : i32
    %c0_i32_1 = arith.constant 0 : i32
    return %c0_i32, %c0_i32_0 : i32, i32
  }
  func.func @transform_3(%arg0: i32) -> (i32, i32) {
    %c0_i32 = arith.constant 0 : i32
    %c0_i32_0 = arith.constant 0 : i32
    %c0_i32_1 = arith.constant 0 : i32
    return %c0_i32, %c0_i32_0 : i32, i32
  }
  func.func @transform_4(%arg0: i32) -> (i32, i32) {
    %c0_i32 = arith.constant 0 : i32
    %c0_i32_0 = arith.constant 0 : i32
    %c0_i32_1 = arith.constant 0 : i32
    return %c0_i32, %c0_i32_0 : i32, i32
  }
  func.func @transform_5(%arg0: i32) -> (i32, i32) {
    %c0_i32 = arith.constant 0 : i32
    %c0_i32_0 = arith.constant 0 : i32
    %c0_i32_1 = arith.constant 0 : i32
    return %c0_i32, %c0_i32_0 : i32, i32
  }
  func.func @transform_6(%arg0: i32) -> (i32, i32) {
    %c0_i32 = arith.constant 0 : i32
    %c0_i32_0 = arith.constant 0 : i32
    return %arg0, %c0_i32 : i32, i32
  }
  func.func @transform_7(%arg0: i32) -> (i32, i32) {
    %c0_i32 = arith.constant 0 : i32
    %c0_i32_0 = arith.constant 0 : i32
    return %arg0, %c0_i32 : i32, i32
  }
}

</mosaic_0001>

<bundles_post_ra>
// kernel: model_forward.1
= control target key start
LH: loop header
LB: loop body
LE: loop exit
PB: predicated region body
PF: predicated region fallthrough
CT: control target
= control target key end

     0   :  { %13 = vsyncpa [#allocation4], 0  ;;  %v547_v1 = vmov 0.0   ;;  %vm548_vm0 = vmmov 0   ;;  %vm55_vm1 = vcmask 261120   ;;  %s687_s0 = inlined_call_operand.vmem [shape: f32[8,32], index: 0, kind: input, shape index: {}]   ;;  %s688_s1 = inlined_call_operand.vmem [shape: bf16[32,128], index: 1, kind: input, shape index: {}]   ;;  %s689_s2 = inlined_call_operand.vmem [shape: f32[1,128], index: 2, kind: input, shape index: {}]   ;;  %s690_s3 = inlined_call_operand.vmem [shape: bf16[128,32], index: 3, kind: input, shape index: {}]   ;;  %s691_s4 = inlined_call_operand.vmem [shape: f32[1,32], index: 4, kind: input, shape index: {}]   ;;  %s692_s5 = inlined_call_operand.vmem [shape: f32[8,48], index: 5, kind: output, shape index: {0}]   ;;  %s693_s6 = inlined_call_operand.hbm [shape: f32[8,8], index: 6, kind: output, shape index: {1}]   ;;  %s694_s7 = inlined_call_operand.hbm [shape: f32[8,8], index: 7, kind: output, shape index: {2}]  }
   0x1   :  { %v487_v0 = vld [vmem:[%s688_s1 + $0x8] sm:$0xff]   ;;  %441 = vmatprep.subr.bf16.mxu0 %v547_v1  ;;  %v488_v2 = vld [vmem:[%s688_s1] sm:$0xff]   ;;  %449 = vmatprep.subr.bf16.mxu1 %v547_v1  ;;  %v489_v4 = vld [vmem:[%s690_s3 + $0x38] sm:$0xff]  }
   0x2   :  { %442 = vmatpush3.bf16.msra.mxu0 %v487_v0  ;;  %445 = vmatprep.mubr.msk.bf16.mxu0 %vm548_vm0, %v547_v1  ;;  %v30_v3 = vld [vmem:[%s687_s0] sm:$0xff]  ;;  %v490_v6 = vld [vmem:[%s690_s3 + $0x30] sm:$0xff]   ;;  %v491_v7 = vld [vmem:[%s690_s3 + $0x28] sm:$0xff]  }
   0x3   :  { %443 = vmatprep.subr.bf16.mxu0 %v547_v1  ;;  %465 = vmatprep.mubr.msk.bf16.mxu1 %vm548_vm0, %v547_v1  ;;  %v36_v5 = vpack.c.bf16 %v30_v3, %v30_v3 }
   0x4   :  { %450 = vmatpush3.bf16.msra.mxu1 %v489_v4 }
   0x5   :  { %451 = vmatprep.subr.bf16.mxu1 %v547_v1 }
   0x6   :  { %444 = vmatpush3.bf16.msra.mxu0 %v488_v2 }
   0x7   :  { %469 = vmatprep.subr.bf16.mxu0 %v547_v1 }
   0x8   :  { %452 = vmatpush3.bf16.msra.mxu1 %v490_v6 }
   0x9   :  { %446 = vmatmul.mubr.msk.bf16.vlgmr.msra.gmra.mxu0 %vm55_vm1, %v36_v5  ;;  %453 = vmatprep.subr.bf16.mxu1 %v547_v1 }
   0xa   :  { %471 = vmatprep.mubr.msk.bf16.mxu0 %vm548_vm0, %v547_v1 }
   0xb   :  { %14 = vsyncpa [#allocation6], 0  ;;  %v492_v8 = vld [vmem:[%s690_s3 + $0x20] sm:$0xff]   ;;  %v493_v9 = vld [vmem:[%s690_s3 + $0x18] sm:$0xff]   ;;  %vm214_vm2 = vcmask 130048   ;;  %vm242_vm3 = vcmask 257024   ;;  %v259_v53 = vlaneseq }
   0xc   :  { %454 = vmatpush3.bf16.msra.mxu1 %v491_v7  ;;  %v494_v10 = vld [vmem:[%s690_s3 + $0x10] sm:$0xff]   ;;  %v495_v11 = vld [vmem:[%s690_s3 + $0x8] sm:$0xff]   ;;  %v496_v12 = vld [vmem:[%s690_s3] sm:$0xff]   ;;  %s550_s3 = smov 32   ;;  %vm314_vm5 = vcmask 64512  }
   0xd   :  { %455 = vmatprep.subr.bf16.mxu1 %v547_v1  ;;  %v408_v13 = vld [vmem:[%s689_s2] ss:$0 sm:$0xff]  ;;  %s549_s2 = smov 112   ;;  %v260_v54 = vshrl.u32 %v259_v53, 7  ;;  %v264_v55 = vand.u32 127, %v259_v53 }
   0xe   :  { %v412_v21 = vld [vmem:[%s691_s4] ss:$0 sm:$0xff]  ;;  %s551_s4 = smov [#allocation3]  }
   0xf   :  { %s382_s25 = sshll.u32 %s551_s4, 4  ;;  %vm265_vm4 = vcmp.ne.s32.totalorder %v260_v54, %v264_v55  ;;  %s383_s25 = int_to_ptr.vmem [resolvable:$true] %s382_s25 }
  0x10   :  { %456 = vmatpush3.bf16.msra.mxu1 %v492_v8  ;;  %s503_s26 = scalar_lea.vmem %s383_s25, 128  ;;  %p508_p1 = scmp.lt.s32.totalorder %s383_s25, %s383_s25 }
  0x11   :  { %457 = vmatprep.subr.bf16.mxu1 %v547_v1  ;;  %p504_p0 = scmp.ne.s32.totalorder %s383_s25, %s503_s26  ;;  %p509_p2 = scmp.lt.s32.totalorder %s503_s26, %s503_s26 }
  0x13   :  { %p510_p3 = por %p509_p2, %p508_p1 }
  0x14   :  { %458 = vmatpush3.bf16.msra.mxu1 %v493_v9 }
  0x15   :  { %459 = vmatprep.subr.bf16.mxu1 %v547_v1  ;;  %p511_p4 = pnand %p510_p3, %p504_p0 }
  0x18   :  { %460 = vmatpush3.bf16.msra.mxu1 %v494_v10 }
  0x19   :  { %461 = vmatprep.subr.bf16.mxu1 %v547_v1 }
  0x1c   :  { %462 = vmatpush3.bf16.msra.mxu1 %v495_v11 }
  0x1d   :  { %463 = vmatprep.subr.bf16.mxu1 %v547_v1 }
  0x20   :  { %464 = vmatpush3.bf16.msra.mxu1 %v496_v12 }
  0xc9   :  { %v93_v14 = vpop.f32.mrf.mxu0 }
  0xca   :  { %v94_v15 = vadd.f32 %v408_v13, %v93_v14 }
  0xcb   :  { %v447_v16 = vpop.f32.mrf.mxu0 }
  0xcc   :  { %v99_v17 = vmax.f32 %v94_v15, 0.0 }
  0xcd   :  { %v96_v18 = vpop.f32.mrf.mxu0 }
  0xce   :  { %v117_v19 = vpack.c.bf16 %v99_v17, %v99_v17 }
  0xcf   :  { %v448_v20 = vpop.f32.mrf.mxu0 }
  0xd0   :  { %466 = vmatmul.mubr.bf16.vlgmr.msra.gmra.mxu1 %v117_v19 }
 0x190   :  { %v206_v22 = vpop.f32.mrf.mxu1 }
 0x191   :  { %v650_v23 = vadd.f32 %v412_v21, %v206_v22 }
 0x192   :  { %v467_v24 = vpop.f32.mrf.mxu1 }
 0x193   :  { %v213_v25 = vmul.f32 %v650_v23, %v650_v23 }
 0x194   :  { %v209_v26 = vpop.f32.mrf.mxu1 }
 0x195   :  { %228 = vrot.lane.b32.xlu0 %v213_v25, %s549_s2  ;;  %v215_v28 = vsel %vm214_vm2, %v213_v25, 0.0 }
 0x196   :  { %v468_v27 = vpop.f32.mrf.mxu1 }
 0x1b4   :  { %216 = vadd.xlane.f32.xlu0 %v215_v28 }
 0x207   :  { %v229_v29 = vpop.permute.xlu0 %228 }
 0x208   :  { %v231_v30 = vsel %vm214_vm2, %v229_v29, 0.0 }
 0x209   :  { %232 = vadd.xlane.f32.xlu1 %v231_v30 }
 0x23d   :  { %v217_v31 = vpop.xlane.xlu0 %216 }
 0x23e   :  { %v218_v32 = vadd.f32 1e-12, %v217_v31 }
 0x240   :  { %499 = vrsqrt.f32 %v218_v32 }
 0x24d   :  { %v500_v35 = vpop.eup %499 }
 0x24e   :  { %v220_v36 = vmul.f32 %v500_v35, %v650_v23 }
 0x250   :  { %v221_v39 = vpack.c.bf16 %v220_v36, %v220_v36 }
 0x292   :  { %v233_v33 = vpop.xlane.xlu1 %232 }
 0x293   :  { %v234_v34 = vadd.f32 1e-12, %v233_v33 }
 0x295   :  { %501 = vrsqrt.f32 %v234_v34 }
 0x2a2   :  { %v502_v37 = vpop.eup %501 }
 0x2a3   :  { %v236_v38 = vmul.f32 %v502_v37, %v650_v23 }
 0x2a5   :  { %v237_v40 = vpack.c.bf16 %v236_v38, %v236_v38 }
 0x2a7   :  { %v240_v41 = vsel %vm214_vm2, %v221_v39, %v237_v40 }
 0x2a8   :  { %243 = vst.msk [vmem:[#allocation2] sm:$0xf] %vm242_vm3, %v240_v41 }
 0x2af   :  { %v258_v42 = vld [vmem:[#allocation2] sm:$0xf] }
 0x2b0   :  { %v271_v43 = vsel %vm214_vm2, %v258_v42, 0  ;;  %v423_v44 = vcombine.low %v258_v42, %v258_v42  ;;  %v257_v45 = vld [vmem:[#allocation2] sm:$0xf] }
 0x2b1   :  { %470 = vmatpush3.bf16.xpose.msra.mxu0 %v271_v43  ;;  %v422_v46 = vcombine.low %v257_v45, %v257_v45 }
 0x2b2   :  { %324 = vrot.lane.b32.xlu1 %v423_v44, %s549_s2  ;;  %475 = vmatprep.subr.bf16.mxu0 %v547_v1 }
 0x2b6   :  { %319 = vrot.lane.b32.xlu1 %v422_v46, %s549_s2 }
 0x2b8   :  { %472 = vmatmul.mubr.msk.bf16.vlgmr.msra.gmra.mxu0 %vm214_vm2, %v257_v45 }
 0x2b9   :  { %477 = vmatprep.mubr.msk.bf16.mxu0 %vm548_vm0, %v547_v1 }
 0x2ba   :  { %223 = vrot.lane.b32.xlu1 %v650_v23, %s549_s2 }
 0x324   :  { %v325_v47 = vpop.permute.xlu1 %324 }
 0x325   :  { %v330_v48 = vsel %vm214_vm2, %v325_v47, 0 }
 0x326   :  { %476 = vmatpush3.bf16.xpose.msra.mxu0 %v330_v48 }
 0x328   :  { %v320_v49 = vpop.permute.xlu1 %319 }
 0x32c   :  { %v224_v50 = vpop.permute.xlu1 %223 }
 0x32d   :  { %v226_v51 = vadd.f32 %v224_v50, %v650_v23  ;;  %478 = vmatmul.mubr.msk.bf16.vlgmr.msra.gmra.mxu0 %vm214_vm2, %v320_v49 }
 0x32f   :  { %v244_v52 = vmul.f32 0.5, %v226_v51 }
 0x331   :  { %246 = vrot.lane.b32.xlu1 %v244_v52, %s550_s3 }
 0x378   :  { %v307_v56 = vpop.f32.mrf.mxu0 }
 0x379   :  { %v313_v57 = vsel %vm265_vm4, %v307_v56, 0.0 }
 0x37a   :  { %v473_v58 = vpop.f32.mrf.mxu0  ;;  %315 = vst.msk [vmem:[#allocation3] sm:$0xff] %vm314_vm5, %v313_v57 }
 0x37b   :  { %514 = shalt.err (!%p511_p4)
}
 0x37c   :  { %385 = dma.vmem_to_hbm [thread:$0]  %s383_s25, 128, %s693_s6, [#allocation4]   ;;  %v310_v59 = vpop.f32.mrf.mxu0  ;;  %vm250_vm6 = vcmask 392192  }
 0x37d   :  { %s552_s8 = smov [#allocation5]  }
 0x37e   :  { %v474_v60 = vpop.f32.mrf.mxu0  ;;  %s392_s1 = sshll.u32 %s552_s8, 4  ;;  %s393_s1 = int_to_ptr.vmem [resolvable:$true] %s392_s1 }
 0x37f   :  { %s523_s6 = scalar_lea.vmem %s393_s1, 128  ;;  %p528_p6 = scmp.lt.s32.totalorder %s393_s1, %s393_s1 }
 0x380   :  { %p524_p5 = scmp.ne.s32.totalorder %s393_s1, %s523_s6  ;;  %p529_p7 = scmp.lt.s32.totalorder %s523_s6, %s523_s6 }
 0x382   :  { %p530_p8 = por %p529_p7, %p528_p6 }
 0x384   :  { %p531_p9 = pnand %p530_p8, %p524_p5 }
 0x3a3   :  { %v247_v61 = vpop.permute.xlu1 %246 }
 0x3a4   :  { %v249_v62 = vsel %vm55_vm1, %v650_v23, %v247_v61 }
 0x3a5   :  { %251 = vst.msk [vmem:[%s692_s5] sm:$0xff] %vm250_vm6, %v249_v62 }
 0x3ed   :  { %v366_v63 = vpop.f32.mrf.mxu0 }
 0x3ee   :  { %v372_v0 = vsel %vm265_vm4, %v366_v63, 0.0 }
 0x3ef   :  { %373 = vst.msk [vmem:[#allocation5] sm:$0xff] %vm314_vm5, %v372_v0  ;;  %v479_v1 = vpop.f32.mrf.mxu0 }
 0x3f0   :  { %534 = shalt.err (!%p531_p9)
}
 0x3f1   :  { %395 = dma.vmem_to_hbm [thread:$0]  %s393_s1, 128, %s694_s7, [#allocation6]   ;;  %v369_v2 = vpop.f32.mrf.mxu0 }
 0x3f3   :  { %v480_v3 = vpop.f32.mrf.mxu0 }
 0x3f4   :  { %543 = dma.done.wait [#allocation4], 128  }
 0x3f5   :  { %544 = vsyncadd [#allocation4], 4294967168 }
 0x3f6   :  { %545 = dma.done.wait [#allocation6], 128  }
 0x3f7   :  { %546 = vsyncadd [#allocation6], 4294967168 }
 0x3f8   :  { %404 = vsyncpa [#allocation4], 1 }
 0x3f9   :  { %405 = vsyncpa [#allocation6], 1 }

</bundles_post_ra>
